<compile_context>
chip_gen: v6e
topology: v6e:2x2x1
jax: 0.10.0
libtpu: 0.0.40
codegen_flags: <defaults>
</compile_context>

<pallas_src>
import jax
import jax.numpy as jnp
from jax.experimental import pallas as pl
from jax.experimental.pallas import tpu as pltpu


def _round_up(a: int, b: int) -> int:
    return (a + b - 1) // b * b


def _kernel_f32_out(x_mm_ref, w_ref, b_ref, x_res_ref, o_ref):
    # Grid = (M tiles, N tiles, K tiles); K (reduction) is last & "arbitrary",
    # so the output tile stays resident across K.  f32 output -> accumulate
    # directly into o_ref (no scratch, no finalize copy).
    @pl.when(pl.program_id(2) == 0)
    def _init():
        # Fold bias + residual into the accumulator init.
        o_ref[...] = x_res_ref[...].astype(jnp.float32) + b_ref[...]

    o_ref[...] += jnp.dot(
        x_mm_ref[...].astype(jnp.bfloat16),  # no-op if the stream is already bf16
        w_ref[...],
        preferred_element_type=jnp.float32,
    )


def _kernel_acc_out(x_mm_ref, w_ref, b_ref, x_res_ref, o_ref, acc_ref):
    # Sub-f32 outputs: resident f32 accumulator, cast once on the last K step.
    k = pl.program_id(2)

    @pl.when(k == 0)
    def _init():
        acc_ref[...] = x_res_ref[...].astype(jnp.float32) + b_ref[...]

    acc_ref[...] += jnp.dot(
        x_mm_ref[...].astype(jnp.bfloat16),
        w_ref[...],
        preferred_element_type=jnp.float32,
    )

    @pl.when(k == pl.num_programs(2) - 1)
    def _finalize():
        o_ref[...] = acc_ref[...].astype(o_ref.dtype)


def residual_linear(x, w, b, *, tile_m=512, tile_n=512, tile_k=512,
                    single_k_max=2048, min_pallas_dim=256, force_pallas=False):
    """out = fn(x) + x with fn = Linear(D, D):  x @ w + b + x (fused).

    x: (B, S, D)   w: (D, D)   b: (D,)
    """
    B, S, D = x.shape
    M = B * S
    out_dtype = x.dtype
    x_item = jnp.dtype(x.dtype).itemsize
    out_item = jnp.dtype(out_dtype).itemsize

    # ---- tiny-D fallback ---------------------------------------------------
    # Padding D up to 128 lanes wastes most of the MXU work and the pad/cast
    # passes dominate; a fused XLA einsum wins on all generations.
    if D < min_pallas_dim and not force_pallas:
        y = jnp.einsum("bsd,de->bse", x, w, preferred_element_type=jnp.float32)
        return (y + b.astype(jnp.float32) + x.astype(jnp.float32)).astype(out_dtype)

    x2 = x.reshape(M, D)

    # ---- tile sizes ----------------------------------------------------------
    # Lane (last) axis multiple of 128, sublane multiple of 8.  D is padded to a
    # multiple of tn; the same padded width serves as both the K and N extents
    # of the single shared x array.
    tn = min(tile_n, _round_up(D, 128))
    Dp = _round_up(D, tn)
    if Dp <= single_k_max:
        tk = Dp                       # single K step: each x/W block fetched once
    else:
        tk = min(max(tile_k, 256), Dp)
        if Dp % tk != 0:
            tk = tn                   # tn always divides Dp
    # M is NOT padded; grid uses cdiv with Pallas partial edge blocks.
    tm = min(tile_m, _round_up(M, 8))

    grid = (pl.cdiv(M, tm), Dp // tn, Dp // tk)

    # ---- padded operands -----------------------------------------------------
    pad_d = Dp - D
    # One padded copy of x serves both the matmul stream and the residual
    # stream (in-kernel bf16 cast), unless x would be re-streamed many times
    # along N, in which case a dedicated bf16 copy halves that DMA traffic.
    share_x = (Dp // tn) <= 4
    x_pad = jnp.pad(x2, ((0, 0), (0, pad_d))) if pad_d else x2
    x_res_arr = x_pad
    x_mm_arr = x_pad if share_x else x_pad.astype(jnp.bfloat16)
    x_mm_item = jnp.dtype(x_mm_arr.dtype).itemsize

    # K padding of x (columns) and W (rows) must be explicit zeros: it is
    # load-bearing for the reduction.  jnp.pad provides exactly that.
    w_pad = jnp.pad(w, ((0, pad_d), (0, pad_d))) if pad_d else w
    w_mm = w_pad.astype(jnp.bfloat16)
    b_f32 = b.astype(jnp.float32)
    b_row = (jnp.pad(b_f32, (0, pad_d)) if pad_d else b_f32).reshape(1, Dp)

    direct_f32 = jnp.dtype(out_dtype) == jnp.float32
    kernel = _kernel_f32_out if direct_f32 else _kernel_acc_out
    scratch = [] if direct_f32 else [pltpu.VMEM((tm, tn), jnp.float32)]

    # ---- VMEM budget (double-buffered inputs + resident output [+ acc]) -----
    vmem_bytes = (
        2 * tm * tk * x_mm_item          # x tile (matmul stream), double-buffered
        + 2 * tk * tn * 2                # W tile (bf16)
        + 2 * 1 * tn * 4                 # bias row (f32)
        + 2 * tm * tn * x_item           # residual x tile
        + 2 * tm * tn * out_item         # output tile
        + (0 if direct_f32 else tm * tn * 4)
    )
    # 2x headroom for compiler-internal scratch; clamp well under v7x's 64 MiB
    # physical VMEM per TensorCore.
    vmem_limit = int(min(max(2 * vmem_bytes, 16 * 1024 * 1024), 48 * 1024 * 1024))

    n_m, n_n, n_k = grid
    cost = pl.CostEstimate(
        flops=2 * M * Dp * Dp,
        transcendentals=0,
        bytes_accessed=int(
            n_n * M * Dp * x_mm_item     # x matmul stream, re-read once per N tile
            + n_m * Dp * Dp * 2          # W (bf16), re-read once per M tile
            + M * Dp * x_item            # residual x stream
            + Dp * 4                     # bias
            + M * Dp * out_item          # output
        ),
    )

    out_pad = pl.pallas_call(
        kernel,
        out_shape=jax.ShapeDtypeStruct((M, Dp), out_dtype),
        grid_spec=pltpu.PrefetchScalarGridSpec(
            num_scalar_prefetch=0,
            grid=grid,
            in_specs=[
                pl.BlockSpec((tm, tk), lambda i, j, k: (i, k)),   # x (matmul stream)
                pl.BlockSpec((tk, tn), lambda i, j, k: (k, j)),   # W (bf16)
                pl.BlockSpec((1, tn), lambda i, j, k: (0, j)),    # bias row (f32)
                pl.BlockSpec((tm, tn), lambda i, j, k: (i, j)),   # x (residual stream)
            ],
            out_specs=pl.BlockSpec((tm, tn), lambda i, j, k: (i, j)),
            scratch_shapes=scratch,
        ),
        compiler_params=pltpu.CompilerParams(
            # M/N parallel -> v7x megacore sharding; K (reduction) arbitrary.
            # (On v7x keep (M/tm)*(N/tn) >= 2 for TC load balance when sweeping.)
            dimension_semantics=("parallel", "parallel", "arbitrary"),
            vmem_limit_bytes=vmem_limit,
        ),
        cost_estimate=cost,
    )(x_mm_arr, w_mm, b_row, x_res_arr)

    out = out_pad[:, :D] if pad_d else out_pad
    return out.reshape(B, S, D)


if __name__ == "__main__":
    # Small transformer-ish shapes: batch=2, seq=8, hidden=32.
    B, S, D = 2, 8, 32
    key = jax.random.PRNGKey(0)
    kx, kw, kb = jax.random.split(key, 3)

    x = jax.random.normal(kx, (B, S, D), dtype=jnp.float32)
    # Deterministic parameter init for the wrapped fn (nn.Linear(D, D)).
    w = jax.random.normal(kw, (D, D), dtype=jnp.float32) * (1.0 / jnp.sqrt(D))
    b = jax.random.normal(kb, (D,), dtype=jnp.float32) * 0.01

    # Reference: fn(x) + x with fn = linear (f32).
    ref = jnp.einsum("bsd,de->bse", x, w) + b + x

    # Pallas path (force past the tiny-D fallback so the kernel itself runs).
    # Kernel uses bf16 MXU operands with f32 accumulation -> bf16-level tolerance.
    out = residual_linear(x, w, b, force_pallas=True)
    out = jax.block_until_ready(out)
    assert out.shape == (B, S, D)
    assert jnp.allclose(out, ref, atol=5e-2, rtol=5e-2), "pallas mismatch vs reference"

    # Fallback path (tiny D -> fused XLA einsum) sanity check.
    out_fb = jax.block_until_ready(residual_linear(x, w, b))
    assert jnp.allclose(out_fb, ref, atol=1e-5, rtol=1e-5), "fallback mismatch"

    print("KERNEL_OK")
</pallas_src>

<mosaic_0001>
module attributes {stable_mosaic.version = 11 : i64} {
  func.func @_kernel_f32_out(%arg0: i32, %arg1: i32, %arg2: i32, %arg3: memref<16x128xf32, #tpu.memory_space<vmem>>, %arg4: memref<128x128xbf16, #tpu.memory_space<vmem>>, %arg5: memref<1x128xf32, #tpu.memory_space<vmem>>, %arg6: memref<16x128xf32, #tpu.memory_space<vmem>>, %arg7: memref<16x128xf32, #tpu.memory_space<vmem>>) attributes {dimension_semantics = [#tpu.dimension_semantics<parallel>, #tpu.dimension_semantics<parallel>, #tpu.dimension_semantics<arbitrary>], iteration_bounds = array<i64: 1, 1, 1>, scalar_prefetch = 0 : i64, scratch_operands = 0 : i64, tpu.core_type = #tpu.core_type<tc>, window_params = [{transform_indices = @transform_0, window_bounds = array<i64: 16, 128>}, {transform_indices = @transform_1, window_bounds = array<i64: 128, 128>}, {transform_indices = @transform_2, window_bounds = array<i64: 1, 128>}, {transform_indices = @transform_3, window_bounds = array<i64: 16, 128>}, {transform_indices = @transform_4, window_bounds = array<i64: 16, 128>}]} {
    %c0_i32 = arith.constant 0 : i32
    %0 = arith.cmpi eq, %arg2, %c0_i32 : i32
    %1 = arith.extui %0 : i1 to i32
    %c0_i32_0 = arith.constant 0 : i32
    %2 = arith.cmpi ne, %1, %c0_i32_0 : i32
    scf.if %2 {
      %c0_8 = arith.constant 0 : index
      %c0_9 = arith.constant 0 : index
      %10 = vector.load %arg6[%c0_8, %c0_9] : memref<16x128xf32, #tpu.memory_space<vmem>>, vector<16x128xf32>
      %c0_10 = arith.constant 0 : index
      %c0_11 = arith.constant 0 : index
      %11 = vector.load %arg5[%c0_10, %c0_11] : memref<1x128xf32, #tpu.memory_space<vmem>>, vector<1x128xf32>
      %12 = vector.broadcast %11 : vector<1x128xf32> to vector<16x128xf32>
      %13 = arith.addf %10, %12 : vector<16x128xf32>
      %c0_12 = arith.constant 0 : index
      %c0_13 = arith.constant 0 : index
      %14 = vector.load %arg7[%c0_12, %c0_13] : memref<16x128xf32, #tpu.memory_space<vmem>>, vector<16x128xf32>
      tpu.vector_store %arg7[%c0_12, %c0_13], %13 {strides = array<i32>} : memref<16x128xf32, #tpu.memory_space<vmem>>, vector<16x128xf32>,
    } else {
    }
    %c0 = arith.constant 0 : index
    %c0_1 = arith.constant 0 : index
    %3 = vector.load %arg7[%c0, %c0_1] : memref<16x128xf32, #tpu.memory_space<vmem>>, vector<16x128xf32>
    %c0_2 = arith.constant 0 : index
    %c0_3 = arith.constant 0 : index
    %4 = vector.load %arg3[%c0_2, %c0_3] : memref<16x128xf32, #tpu.memory_space<vmem>>, vector<16x128xf32>
    %5 = arith.truncf %4 : vector<16x128xf32> to vector<16x128xbf16>
    %c0_4 = arith.constant 0 : index
    %c0_5 = arith.constant 0 : index
    %6 = vector.load %arg4[%c0_4, %c0_5] : memref<128x128xbf16, #tpu.memory_space<vmem>>, vector<128x128xbf16>
    %cst = arith.constant dense<0.000000e+00> : vector<16x128xf32>
    %7 = tpu.matmul %5, %6, %cst {dimension_numbers = #tpu.dot_dimension_numbers<[1], [0], [0], [1], [0, 0, 1, 1], [], []>} : vector<16x128xbf16>, vector<128x128xbf16>, vector<16x128xf32> -> vector<16x128xf32>
    %8 = arith.addf %3, %7 : vector<16x128xf32>
    %c0_6 = arith.constant 0 : index
    %c0_7 = arith.constant 0 : index
    %9 = vector.load %arg7[%c0_6, %c0_7] : memref<16x128xf32, #tpu.memory_space<vmem>>, vector<16x128xf32>
    tpu.vector_store %arg7[%c0_6, %c0_7], %8 {strides = array<i32>} : memref<16x128xf32, #tpu.memory_space<vmem>>, vector<16x128xf32>,
    return
  }
  func.func @transform_0(%arg0: i32, %arg1: i32, %arg2: i32) -> (i32, i32) {
    %c0_i32 = arith.constant 0 : i32
    return %arg0, %arg2 : i32, i32
  }
  func.func @transform_1(%arg0: i32, %arg1: i32, %arg2: i32) -> (i32, i32) {
    %c0_i32 = arith.constant 0 : i32
    return %arg2, %arg1 : i32, i32
  }
  func.func @transform_2(%arg0: i32, %arg1: i32, %arg2: i32) -> (i32, i32) {
    %c0_i32 = arith.constant 0 : i32
    %c0_i32_0 = arith.constant 0 : i32
    return %c0_i32, %arg1 : i32, i32
  }
  func.func @transform_3(%arg0: i32, %arg1: i32, %arg2: i32) -> (i32, i32) {
    %c0_i32 = arith.constant 0 : i32
    return %arg0, %arg1 : i32, i32
  }
  func.func @transform_4(%arg0: i32, %arg1: i32, %arg2: i32) -> (i32, i32) {
    %c0_i32 = arith.constant 0 : i32
    return %arg0, %arg1 : i32, i32
  }
}

</mosaic_0001>

<bundles_post_ra>
// kernel: tpu_custom_call.1
= control target key start
LH: loop header
LB: loop body
LE: loop exit
PB: predicated region body
PF: predicated region fallthrough
CT: control target
= control target key end

     0   :  { %9 = vsyncpa [#allocation3], 0  ;;  %s410_s0 = inlined_call_operand.hbm [shape: f32[16,128], index: 0, kind: input, shape index: {}]   ;;  %s411_s1 = inlined_call_operand.hbm [shape: bf16[128,128], index: 1, kind: input, shape index: {}]   ;;  %s412_s2 = inlined_call_operand.vmem [shape: f32[1,128], index: 2, kind: input, shape index: {}]   ;;  %s413_s3 = inlined_call_operand.hbm [shape: f32[16,128], index: 3, kind: input, shape index: {}]   ;;  %s414_s4 = inlined_call_operand.hbm [shape: f32[16,128], index: 4, kind: output, shape index: {}]  }
   0x1   :  { %10 = vsyncpa [#allocation6], 0 }
   0x2   :  { %11 = vsyncpa [#allocation4], 0  ;;  %s351_s15 = smov [#allocation5]  }
   0x3   :  { %s29_s16 = sshll.u32 %s351_s15, 4  ;;  %s30_s16 = int_to_ptr.vmem [resolvable:$true] %s29_s16 }
   0x4   :  { %s273_s17 = scalar_lea.vmem %s30_s16, 1024  ;;  %p278_p1 = scmp.lt.s32.totalorder %s30_s16, %s30_s16 }
   0x5   :  { %p274_p0 = scmp.ne.s32.totalorder %s30_s16, %s273_s17  ;;  %p279_p2 = scmp.lt.s32.totalorder %s273_s17, %s273_s17 }
   0x7   :  { %p280_p3 = por %p279_p2, %p278_p1 }
   0x9   :  { %p281_p4 = pnand %p280_p3, %p274_p0 }
   0xb   :  { %284 = shalt.err (!%p281_p4)
}
   0xc   :  { %s352_s18 = smov 64   ;;  %s353_s19 = smov 4  }
   0xd   :  { %35 = dma.hbm_to_vmem [thread:$0]  %s411_s1, 1024, %s30_s16, [#allocation6], %s352_s18, %s352_s18, %s353_s19  }
   0xe   :  { %s354_s22 = smov [#allocation2]  }
   0xf   :  { %s17_s23 = sshll.u32 %s354_s22, 4  ;;  %s18_s23 = int_to_ptr.vmem [resolvable:$true] %s17_s23 }
  0x10   :  { %s293_s24 = scalar_lea.vmem %s18_s23, 256  ;;  %p298_p6 = scmp.lt.s32.totalorder %s18_s23, %s18_s23 }
  0x11   :  { %p294_p5 = scmp.ne.s32.totalorder %s18_s23, %s293_s24  ;;  %p299_p7 = scmp.lt.s32.totalorder %s293_s24, %s293_s24 }
  0x13   :  { %p300_p8 = por %p299_p7, %p298_p6 }
  0x15   :  { %p301_p9 = pnand %p300_p8, %p294_p5 }
  0x17   :  { %304 = shalt.err (!%p301_p9)
}
  0x18   :  { %s355_s25 = smov 128   ;;  %s356_s26 = smov 8  }
  0x19   :  { %23 = dma.hbm_to_vmem [thread:$0]  %s410_s0, 256, %s18_s23, [#allocation3], %s355_s25, %s355_s25, %s356_s26  }
  0x1a   :  { %s357_s1 = smov [#allocation7]  }
  0x1b   :  { %s43_s29 = sshll.u32 %s357_s1, 4  ;;  %s44_s29 = int_to_ptr.vmem [resolvable:$true] %s43_s29 }
  0x1c   :  { %s313_s30 = scalar_lea.vmem %s44_s29, 256  ;;  %p318_p11 = scmp.lt.s32.totalorder %s44_s29, %s44_s29 }
  0x1d   :  { %p314_p10 = scmp.ne.s32.totalorder %s44_s29, %s313_s30  ;;  %p319_p12 = scmp.lt.s32.totalorder %s313_s30, %s313_s30 }
  0x1f   :  { %p320_p13 = por %p319_p12, %p318_p11 }
  0x21   :  { %p321_p0 = pnand %p320_p13, %p314_p10 }
  0x23   :  { %324 = shalt.err (!%p321_p0)
}
  0x24   :  { %49 = dma.hbm_to_vmem [thread:$0]  %s413_s3, 256, %s44_s29, [#allocation6], %s355_s25, %s355_s25, %s356_s26  }
  0x25   :  { %345 = dma.done.wait [#allocation3], 256  }
  0x26   :  { %346 = vsyncadd [#allocation3], 4294967040 }
  0x27   :  { %347 = dma.done.wait [#allocation6], 1280  }
  0x28   :  { %348 = vsyncadd [#allocation6], 4294966016  ;;  %v358_v0 = vmov 0.0   ;;  %vm359_vm0 = vmmov 0   ;;  %v257_v1 = vld [vmem:[#allocation5 + $0x38] sm:$0xff]   ;;  %v258_v2 = vld [vmem:[#allocation5 + $0x30] sm:$0xff]  }
  0x29   :  { %227 = vmatprep.subr.bf16.mxu0 %v358_v0  ;;  %243 = vmatprep.mubr.msk.bf16.mxu0 %vm359_vm0, %v358_v0  ;;  %v259_v3 = vld [vmem:[#allocation5 + $0x28] sm:$0xff]   ;;  %v260_v4 = vld [vmem:[#allocation5 + $0x20] sm:$0xff]   ;;  %v261_v5 = vld [vmem:[#allocation5 + $0x18] sm:$0xff]   ;;  %s360_s7 = smov [#allocation8]  }
  0x2a   :  { %228 = vmatpush3.bf16.msra.mxu0 %v257_v1  ;;  %v262_v6 = vld [vmem:[#allocation5 + $0x10] sm:$0xff]   ;;  %v263_v7 = vld [vmem:[#allocation5 + $0x8] sm:$0xff]   ;;  %v264_v8 = vld [vmem:[#allocation5] sm:$0xff]   ;;  %s196_s8 = sshll.u32 %s360_s7, 4  ;;  %s197_s8 = int_to_ptr.vmem [resolvable:$true] %s196_s8 }
  0x2b   :  { %229 = vmatprep.subr.bf16.mxu0 %v358_v0  ;;  %v79_v9 = vld [vmem:[#allocation2] sm:$0xff]  ;;  %v80_v10 = vld [vmem:[#allocation2 + $0x8] sm:$0xff]  ;;  %v64_v12 = vld [vmem:[#allocation7] sm:$0xff]  ;;  %s325_s9 = scalar_lea.vmem %s197_s8, 256  ;;  %p330_p2 = scmp.lt.s32.totalorder %s197_s8, %s197_s8 }
  0x2c   :  { %v81_v11 = vpack.c.bf16 %v80_v10, %v79_v9  ;;  %v209_v13 = vld [vmem:[%s412_s2] ss:$0 sm:$0xff]  ;;  %v65_v15 = vld [vmem:[#allocation7 + $0x8] sm:$0xff]  ;;  %p326_p1 = scmp.ne.s32.totalorder %s197_s8, %s325_s9  ;;  %p331_p3 = scmp.lt.s32.totalorder %s325_s9, %s325_s9 }
  0x2d   :  { %v73_v14 = vadd.f32 %v209_v13, %v64_v12  ;;  %v74_v18 = vadd.f32 %v209_v13, %v65_v15 }
  0x2e   :  { %230 = vmatpush3.bf16.msra.mxu0 %v258_v2  ;;  %p332_p4 = por %p331_p3, %p330_p2 }
  0x2f   :  { %231 = vmatprep.subr.bf16.mxu0 %v358_v0 }
  0x30   :  { %p333_p5 = pnand %p332_p4, %p326_p1 }
  0x32   :  { %232 = vmatpush3.bf16.msra.mxu0 %v259_v3 }
  0x33   :  { %233 = vmatprep.subr.bf16.mxu0 %v358_v0 }
  0x36   :  { %234 = vmatpush3.bf16.msra.mxu0 %v260_v4 }
  0x37   :  { %235 = vmatprep.subr.bf16.mxu0 %v358_v0 }
  0x3a   :  { %236 = vmatpush3.bf16.msra.mxu0 %v261_v5 }
  0x3b   :  { %237 = vmatprep.subr.bf16.mxu0 %v358_v0 }
  0x3e   :  { %238 = vmatpush3.bf16.msra.mxu0 %v262_v6 }
  0x3f   :  { %239 = vmatprep.subr.bf16.mxu0 %v358_v0 }
  0x42   :  { %240 = vmatpush3.bf16.msra.mxu0 %v263_v7 }
  0x43   :  { %241 = vmatprep.subr.bf16.mxu0 %v358_v0 }
  0x46   :  { %242 = vmatpush3.bf16.msra.mxu0 %v264_v8 }
  0x49   :  { %244 = vmatmul.mubr.bf16.vlgmr.msra.gmra.mxu0 %v81_v11 }
 0x109   :  { %v180_v16 = vpop.f32.mrf.mxu0 }
 0x10a   :  { %v187_v17 = vadd.f32 %v180_v16, %v73_v14 }
 0x10b   :  { %v245_v19 = vpop.f32.mrf.mxu0 }
 0x10c   :  { %189 = vst [vmem:[#allocation8] sm:$0xff] %v187_v17 }
 0x10d   :  { %v183_v20 = vpop.f32.mrf.mxu0 }
 0x10e   :  { %v188_v21 = vadd.f32 %v183_v20, %v74_v18 }
 0x10f   :  { %v246_v22 = vpop.f32.mrf.mxu0 }
 0x110   :  { %190 = vst [vmem:[#allocation8 + $0x8] sm:$0xff] %v188_v21 }
 0x111   :  { %336 = shalt.err (!%p333_p5)
}
 0x112   :  { %202 = dma.vmem_to_hbm [thread:$0]  %s197_s8, 256, %s414_s4, [#allocation4], %s355_s25, %s355_s25, %s356_s26  }
 0x113   :  { %349 = dma.done.wait [#allocation4], 256  }
 0x114   :  { %350 = vsyncadd [#allocation4], 4294967040 }
 0x115   :  { %206 = vsyncpa [#allocation3], 1 }
 0x116   :  { %207 = vsyncpa [#allocation6], 1 }
 0x117   :  { %208 = vsyncpa [#allocation4], 1 }

</bundles_post_ra>
